<compile_context>
chip_gen: v6e
topology: v6e:2x2x1
jax: 0.10.0
libtpu: 0.0.40
codegen_flags: <defaults>
</compile_context>

<pallas_src>
import jax
import jax.numpy as jnp
from jax.experimental import pallas as pl
from jax.experimental.pallas import tpu as pltpu

EPS = 1e-6


def _round_up(x, m):
    return ((x + m - 1) // m) * m


def sublayer_connection_kernel(x_ref, w_ref, bl_ref, a_ref, b_ref, o_ref):
    # x_ref: (TM, D)  w_ref: (D, D)  bl_ref/a_ref/b_ref: (1, D)  o_ref: (TM, D)
    x = x_ref[...]

    # Example sublayer: Linear(D, D). Feed the MXU in W's dtype (bf16 when the
    # wrapper downcast W), accumulate in f32. Only this matmul sees reduced
    # precision; the residual + LayerNorm below is f32.
    xm = x if x.dtype == w_ref.dtype else x.astype(w_ref.dtype)
    sub = jnp.dot(xm, w_ref[...], preferred_element_type=jnp.float32)

    # Residual connection (+ linear bias); dropout is identity in eval mode.
    y = x.astype(jnp.float32) + sub + bl_ref[...].astype(jnp.float32)

    # LayerNorm, module semantics: mean over last axis, unbiased (n-1) std,
    # eps added to the std. Two-pass (mean -> center -> var) kept for
    # numerical stability over the sum(y)/sum(y*y) single-pass variant.
    n = y.shape[-1]
    mean = jnp.mean(y, axis=-1, keepdims=True)
    d = y - mean
    var_unbiased = jnp.sum(d * d, axis=-1, keepdims=True) * (1.0 / (n - 1))
    std = jnp.sqrt(var_unbiased)
    # Exact reciprocal: approx=True (EUP estimate) drifted vs the reference and
    # the divide is nowhere near the bottleneck here.
    inv = pl.reciprocal(std + EPS, approx=False)

    out = a_ref[...].astype(jnp.float32) * (d * inv) + b_ref[...].astype(jnp.float32)
    o_ref[...] = out.astype(o_ref.dtype)


def sublayer_connection(x, w, b_lin, a_2, b_2, *,
                        matmul_dtype=jnp.bfloat16,
                        tile_budget_bytes=2 * 1024 * 1024):
    """x: [B, S, D]; w: [D, D]; b_lin, a_2, b_2: [D]."""
    B, S, D = x.shape
    rows = B * S
    x2 = x.reshape(rows, D)
    itemsize = x.dtype.itemsize

    # Downcast W for the MXU (example-sublayer matmul only); halves W's
    # resident VMEM / HBM DMA and avoids multi-pass f32 MXU emulation.
    w_mm = w
    if matmul_dtype is not None and w.dtype != matmul_dtype:
        w_mm = w.astype(matmul_dtype)

    # Row tile: ~tile_budget_bytes of x per tile (amortizes the ~0.35us/step
    # grid overhead and keeps the DMA wide), capped at 2048 rows, clamped so
    # there are >= 2 row tiles when possible (v7x megacore) and never larger
    # than the (8-rounded) row count. No host-side padding: the partial last
    # block is masked by Pallas.
    tm = max(8, min(tile_budget_bytes // max(D * itemsize, 1), 2048))
    tm = min(tm, max(_round_up(pl.cdiv(rows, 2), 8), 8))
    tm = min(tm, _round_up(rows, 8))
    tm = _round_up(tm, 8)
    grid_rows = pl.cdiv(rows, tm)

    # VMEM budget: double-buffered x-in + out tiles, resident W + small params,
    # plus ~6 f32 tile-sized epilogue temporaries (bf16 copy, sub, y, d, d*inv,
    # out). Cap below v7x's 64 MiB physical VMEM per TensorCore; 48 MiB also
    # leaves headroom on v5e/v6e (128 MiB).
    w_bytes = D * D * w_mm.dtype.itemsize
    est = (2 * 2 * tm * D * itemsize        # pipelined x / out buffers
           + 2 * (w_bytes + 3 * D * 4)      # W + b_lin/a_2/b_2 (worst case 2x)
           + 6 * tm * D * 4)                # f32 epilogue temporaries
    vmem_limit = int(min(max(est + (8 << 20), 32 << 20), 48 << 20))

    bl = b_lin.reshape(1, D)
    a2 = a_2.reshape(1, D)
    b2 = b_2.reshape(1, D)

    def _run(single_buffer_consts):
        const_kwargs = {}
        if single_buffer_consts:
            # Constant-index operands never change across the grid; a single
            # buffer avoids wasting VMEM on a useless double buffer.
            const_kwargs = dict(pipeline_mode=pl.Buffered(1))
        in_specs = [
            pl.BlockSpec((tm, D), lambda i: (i, 0)),                  # x row tile
            pl.BlockSpec((D, D), lambda i: (0, 0), **const_kwargs),   # W (resident)
            pl.BlockSpec((1, D), lambda i: (0, 0), **const_kwargs),   # linear bias
            pl.BlockSpec((1, D), lambda i: (0, 0), **const_kwargs),   # a_2 (gamma)
            pl.BlockSpec((1, D), lambda i: (0, 0), **const_kwargs),   # b_2 (beta)
        ]
        call = pl.pallas_call(
            sublayer_connection_kernel,
            out_shape=jax.ShapeDtypeStruct((rows, D), x.dtype),
            grid_spec=pltpu.PrefetchScalarGridSpec(
                num_scalar_prefetch=0,
                grid=(grid_rows,),
                in_specs=in_specs,
                out_specs=pl.BlockSpec((tm, D), lambda i: (i, 0)),
            ),
            compiler_params=pltpu.CompilerParams(
                dimension_semantics=("parallel",),
                vmem_limit_bytes=vmem_limit,
            ),
        )
        return jax.block_until_ready(call(x2, w_mm, bl, a2, b2))

    try:
        out2 = _run(True)
    except Exception:
        # pipeline_mode=pl.Buffered(1) not supported by this build: fall back
        # to default double-buffered constant operands (same semantics).
        out2 = _run(False)

    return out2.reshape(B, S, D)


def _reference(x, w, b_lin, a_2, b_2):
    """Pure-JAX reference mirroring the PyTorch forward (eval mode, f32)."""
    sub = jnp.einsum("bsd,de->bse", x, w) + b_lin
    y = x + sub
    mean = jnp.mean(y, axis=-1, keepdims=True)
    d = y - mean
    n = y.shape[-1]
    std = jnp.sqrt(jnp.sum(d * d, axis=-1, keepdims=True) / (n - 1))
    return a_2 * d / (std + EPS) + b_2


if __name__ == "__main__":
    # Small, lane-friendly shape: hidden D = 128 fills the 128-lane vreg axis.
    B, S, D = 2, 8, 128

    key = jax.random.PRNGKey(0)
    kx, kw, kb = jax.random.split(key, 3)

    x = jax.random.normal(kx, (B, S, D), dtype=jnp.float32)

    # Example sublayer parameters (Linear(D, D)), deterministic.
    w = jax.random.normal(kw, (D, D), dtype=jnp.float32) * 0.05
    b_lin = jax.random.normal(kb, (D,), dtype=jnp.float32) * 0.05

    # LayerNorm parameters per __init__: a_2 = ones, b_2 = zeros.
    a_2 = jnp.ones((D,), dtype=jnp.float32)
    b_2 = jnp.zeros((D,), dtype=jnp.float32)

    out = sublayer_connection(x, w, b_lin, a_2, b_2)
    out = jax.block_until_ready(out)

    ref = _reference(x, w, b_lin, a_2, b_2)
    assert out.shape == (B, S, D)
    # Tolerance covers the bf16-input MXU matmul of the example sublayer (the
    # residual + LayerNorm path is f32); estimated worst-case deviation vs the
    # f32 reference is ~4e-3 on O(1) normalized outputs.
    assert jnp.allclose(out, ref, atol=2e-2, rtol=2e-2), (
        float(jnp.max(jnp.abs(out - ref))))

    print("KERNEL_OK")
</pallas_src>

<mosaic_0001>
module attributes {stable_mosaic.version = 11 : i64} {
  func.func @sublayer_connection_kernel(%arg0: i32, %arg1: memref<8x128xf32, #tpu.memory_space<vmem>>, %arg2: memref<128x128xbf16, #tpu.memory_space<vmem>>, %arg3: memref<1x128xf32, #tpu.memory_space<vmem>>, %arg4: memref<1x128xf32, #tpu.memory_space<vmem>>, %arg5: memref<1x128xf32, #tpu.memory_space<vmem>>, %arg6: memref<8x128xf32, #tpu.memory_space<vmem>>) attributes {dimension_semantics = [#tpu.dimension_semantics<parallel>], iteration_bounds = array<i64: 2>, scalar_prefetch = 0 : i64, scratch_operands = 0 : i64, tpu.core_type = #tpu.core_type<tc>, window_params = [{transform_indices = @transform_0, window_bounds = array<i64: 8, 128>}, {pipeline_mode = #tpu.pipeline_mode<synchronous>, transform_indices = @transform_1, window_bounds = array<i64: 128, 128>}, {pipeline_mode = #tpu.pipeline_mode<synchronous>, transform_indices = @transform_2, window_bounds = array<i64: 1, 128>}, {pipeline_mode = #tpu.pipeline_mode<synchronous>, transform_indices = @transform_3, window_bounds = array<i64: 1, 128>}, {pipeline_mode = #tpu.pipeline_mode<synchronous>, transform_indices = @transform_4, window_bounds = array<i64: 1, 128>}, {transform_indices = @transform_5, window_bounds = array<i64: 8, 128>}]} {
    %c0 = arith.constant 0 : index
    %c0_0 = arith.constant 0 : index
    %0 = vector.load %arg1[%c0, %c0_0] : memref<8x128xf32, #tpu.memory_space<vmem>>, vector<8x128xf32>
    %1 = arith.truncf %0 : vector<8x128xf32> to vector<8x128xbf16>
    %c0_1 = arith.constant 0 : index
    %c0_2 = arith.constant 0 : index
    %2 = vector.load %arg2[%c0_1, %c0_2] : memref<128x128xbf16, #tpu.memory_space<vmem>>, vector<128x128xbf16>
    %cst = arith.constant dense<0.000000e+00> : vector<8x128xf32>
    %3 = tpu.matmul %1, %2, %cst {dimension_numbers = #tpu.dot_dimension_numbers<[1], [0], [0], [1], [0, 0, 1, 1], [], []>} : vector<8x128xbf16>, vector<128x128xbf16>, vector<8x128xf32> -> vector<8x128xf32>
    %4 = arith.addf %0, %3 : vector<8x128xf32>
    %c0_3 = arith.constant 0 : index
    %c0_4 = arith.constant 0 : index
    %5 = vector.load %arg3[%c0_3, %c0_4] : memref<1x128xf32, #tpu.memory_space<vmem>>, vector<1x128xf32>
    %6 = vector.broadcast %5 : vector<1x128xf32> to vector<8x128xf32>
    %7 = arith.addf %4, %6 : vector<8x128xf32>
    %cst_5 = arith.constant dense<0.000000e+00> : vector<8xf32>
    %8 = vector.multi_reduction <add>, %7, %cst_5 [1] : vector<8x128xf32> to vector<8xf32>
    %9 = vector.shape_cast %8 : vector<8xf32> to vector<8x1xf32>
    %cst_6 = arith.constant 1.280000e+02 : f32
    %10 = vector.broadcast %cst_6 : f32 to vector<8x1xf32>
    %11 = arith.divf %9, %10 : vector<8x1xf32>
    %12 = vector.broadcast %11 : vector<8x1xf32> to vector<8x128xf32>
    %13 = arith.subf %7, %12 : vector<8x128xf32>
    %14 = arith.mulf %13, %13 : vector<8x128xf32>
    %cst_7 = arith.constant dense<0.000000e+00> : vector<8xf32>
    %15 = vector.multi_reduction <add>, %14, %cst_7 [1] : vector<8x128xf32> to vector<8xf32>
    %16 = vector.shape_cast %15 : vector<8xf32> to vector<8x1xf32>
    %cst_8 = arith.constant 0.00787401571 : f32
    %17 = vector.broadcast %cst_8 : f32 to vector<8x1xf32>
    %18 = arith.mulf %16, %17 : vector<8x1xf32>
    %19 = math.sqrt %18 : vector<8x1xf32>
    %cst_9 = arith.constant 9.99999997E-7 : f32
    %20 = vector.broadcast %cst_9 : f32 to vector<8x1xf32>
    %21 = arith.addf %19, %20 : vector<8x1xf32>
    %22 = tpu.reciprocal %21 : vector<8x1xf32> -> vector<8x1xf32>
    %c0_10 = arith.constant 0 : index
    %c0_11 = arith.constant 0 : index
    %23 = vector.load %arg4[%c0_10, %c0_11] : memref<1x128xf32, #tpu.memory_space<vmem>>, vector<1x128xf32>
    %24 = vector.broadcast %22 : vector<8x1xf32> to vector<8x128xf32>
    %25 = arith.mulf %13, %24 : vector<8x128xf32>
    %26 = vector.broadcast %23 : vector<1x128xf32> to vector<8x128xf32>
    %27 = arith.mulf %26, %25 : vector<8x128xf32>
    %c0_12 = arith.constant 0 : index
    %c0_13 = arith.constant 0 : index
    %28 = vector.load %arg5[%c0_12, %c0_13] : memref<1x128xf32, #tpu.memory_space<vmem>>, vector<1x128xf32>
    %29 = vector.broadcast %28 : vector<1x128xf32> to vector<8x128xf32>
    %30 = arith.addf %27, %29 : vector<8x128xf32>
    %c0_14 = arith.constant 0 : index
    %c0_15 = arith.constant 0 : index
    %31 = vector.load %arg6[%c0_14, %c0_15] : memref<8x128xf32, #tpu.memory_space<vmem>>, vector<8x128xf32>
    tpu.vector_store %arg6[%c0_14, %c0_15], %30 {strides = array<i32>} : memref<8x128xf32, #tpu.memory_space<vmem>>, vector<8x128xf32>,
    return
  }
  func.func @transform_0(%arg0: i32) -> (i32, i32) {
    %c0_i32 = arith.constant 0 : i32
    %c0_i32_0 = arith.constant 0 : i32
    return %arg0, %c0_i32 : i32, i32
  }
  func.func @transform_1(%arg0: i32) -> (i32, i32) {
    %c0_i32 = arith.constant 0 : i32
    %c0_i32_0 = arith.constant 0 : i32
    %c0_i32_1 = arith.constant 0 : i32
    return %c0_i32, %c0_i32_0 : i32, i32
  }
  func.func @transform_2(%arg0: i32) -> (i32, i32) {
    %c0_i32 = arith.constant 0 : i32
    %c0_i32_0 = arith.constant 0 : i32
    %c0_i32_1 = arith.constant 0 : i32
    return %c0_i32, %c0_i32_0 : i32, i32
  }
  func.func @transform_3(%arg0: i32) -> (i32, i32) {
    %c0_i32 = arith.constant 0 : i32
    %c0_i32_0 = arith.constant 0 : i32
    %c0_i32_1 = arith.constant 0 : i32
    return %c0_i32, %c0_i32_0 : i32, i32
  }
  func.func @transform_4(%arg0: i32) -> (i32, i32) {
    %c0_i32 = arith.constant 0 : i32
    %c0_i32_0 = arith.constant 0 : i32
    %c0_i32_1 = arith.constant 0 : i32
    return %c0_i32, %c0_i32_0 : i32, i32
  }
  func.func @transform_5(%arg0: i32) -> (i32, i32) {
    %c0_i32 = arith.constant 0 : i32
    %c0_i32_0 = arith.constant 0 : i32
    return %arg0, %c0_i32 : i32, i32
  }
}

module attributes {stable_mosaic.version = 11 : i64} {
  func.func @sublayer_connection_kernel(%arg0: i32, %arg1: memref<8x128xf32, #tpu.memory_space<vmem>>, %arg2: memref<128x128xbf16, #tpu.memory_space<vmem>>, %arg3: memref<1x128xf32, #tpu.memory_space<vmem>>, %arg4: memref<1x128xf32, #tpu.memory_space<vmem>>, %arg5: memref<1x128xf32, #tpu.memory_space<vmem>>, %arg6: memref<8x128xf32, #tpu.memory_space<vmem>>) attributes {dimension_semantics = [#tpu.dimension_semantics<parallel>], iteration_bounds = array<i64: 2>, scalar_prefetch = 0 : i64, scratch_operands = 0 : i64, tpu.core_type = #tpu.core_type<tc>, window_params = [{transform_indices = @transform_0, window_bounds = array<i64: 8, 128>}, {pipeline_mode = #tpu.pipeline_mode<synchronous>, transform_indices = @transform_1, window_bounds = array<i64: 128, 128>}, {pipeline_mode = #tpu.pipeline_mode<synchronous>, transform_indices = @transform_2, window_bounds = array<i64: 1, 128>}, {pipeline_mode = #tpu.pipeline_mode<synchronous>, transform_indices = @transform_3, window_bounds = array<i64: 1, 128>}, {pipeline_mode = #tpu.pipeline_mode<synchronous>, transform_indices = @transform_4, window_bounds = array<i64: 1, 128>}, {transform_indices = @transform_5, window_bounds = array<i64: 8, 128>}]} {
    %c0 = arith.constant 0 : index
    %c0_0 = arith.constant 0 : index
    %0 = vector.load %arg1[%c0, %c0_0] : memref<8x128xf32, #tpu.memory_space<vmem>>, vector<8x128xf32>
    %1 = arith.truncf %0 : vector<8x128xf32> to vector<8x128xbf16>
    %c0_1 = arith.constant 0 : index
    %c0_2 = arith.constant 0 : index
    %2 = vector.load %arg2[%c0_1, %c0_2] : memref<128x128xbf16, #tpu.memory_space<vmem>>, vector<128x128xbf16>
    %cst = arith.constant dense<0.000000e+00> : vector<8x128xf32>
    %3 = tpu.matmul %1, %2, %cst {dimension_numbers = #tpu.dot_dimension_numbers<[1], [0], [0], [1], [0, 0, 1, 1], [], []>} : vector<8x128xbf16>, vector<128x128xbf16>, vector<8x128xf32> -> vector<8x128xf32>
    %4 = arith.addf %0, %3 : vector<8x128xf32>
    %c0_3 = arith.constant 0 : index
    %c0_4 = arith.constant 0 : index
    %5 = vector.load %arg3[%c0_3, %c0_4] : memref<1x128xf32, #tpu.memory_space<vmem>>, vector<1x128xf32>
    %6 = vector.broadcast %5 : vector<1x128xf32> to vector<8x128xf32>
    %7 = arith.addf %4, %6 : vector<8x128xf32>
    %cst_5 = arith.constant dense<0.000000e+00> : vector<8xf32>
    %8 = vector.multi_reduction <add>, %7, %cst_5 [1] : vector<8x128xf32> to vector<8xf32>
    %9 = vector.shape_cast %8 : vector<8xf32> to vector<8x1xf32>
    %cst_6 = arith.constant 1.280000e+02 : f32
    %10 = vector.broadcast %cst_6 : f32 to vector<8x1xf32>
    %11 = arith.divf %9, %10 : vector<8x1xf32>
    %12 = vector.broadcast %11 : vector<8x1xf32> to vector<8x128xf32>
    %13 = arith.subf %7, %12 : vector<8x128xf32>
    %14 = arith.mulf %13, %13 : vector<8x128xf32>
    %cst_7 = arith.constant dense<0.000000e+00> : vector<8xf32>
    %15 = vector.multi_reduction <add>, %14, %cst_7 [1] : vector<8x128xf32> to vector<8xf32>
    %16 = vector.shape_cast %15 : vector<8xf32> to vector<8x1xf32>
    %cst_8 = arith.constant 0.00787401571 : f32
    %17 = vector.broadcast %cst_8 : f32 to vector<8x1xf32>
    %18 = arith.mulf %16, %17 : vector<8x1xf32>
    %19 = math.sqrt %18 : vector<8x1xf32>
    %cst_9 = arith.constant 9.99999997E-7 : f32
    %20 = vector.broadcast %cst_9 : f32 to vector<8x1xf32>
    %21 = arith.addf %19, %20 : vector<8x1xf32>
    %22 = tpu.reciprocal %21 : vector<8x1xf32> -> vector<8x1xf32>
    %c0_10 = arith.constant 0 : index
    %c0_11 = arith.constant 0 : index
    %23 = vector.load %arg4[%c0_10, %c0_11] : memref<1x128xf32, #tpu.memory_space<vmem>>, vector<1x128xf32>
    %24 = vector.broadcast %22 : vector<8x1xf32> to vector<8x128xf32>
    %25 = arith.mulf %13, %24 : vector<8x128xf32>
    %26 = vector.broadcast %23 : vector<1x128xf32> to vector<8x128xf32>
    %27 = arith.mulf %26, %25 : vector<8x128xf32>
    %c0_12 = arith.constant 0 : index
    %c0_13 = arith.constant 0 : index
    %28 = vector.load %arg5[%c0_12, %c0_13] : memref<1x128xf32, #tpu.memory_space<vmem>>, vector<1x128xf32>
    %29 = vector.broadcast %28 : vector<1x128xf32> to vector<8x128xf32>
    %30 = arith.addf %27, %29 : vector<8x128xf32>
    %c0_14 = arith.constant 0 : index
    %c0_15 = arith.constant 0 : index
    %31 = vector.load %arg6[%c0_14, %c0_15] : memref<8x128xf32, #tpu.memory_space<vmem>>, vector<8x128xf32>
    tpu.vector_store %arg6[%c0_14, %c0_15], %30 {strides = array<i32>} : memref<8x128xf32, #tpu.memory_space<vmem>>, vector<8x128xf32>,
    return
  }
  func.func @transform_0(%arg0: i32) -> (i32, i32) {
    %c0_i32 = arith.constant 0 : i32
    %c0_i32_0 = arith.constant 0 : i32
    return %arg0, %c0_i32 : i32, i32
  }
  func.func @transform_1(%arg0: i32) -> (i32, i32) {
    %c0_i32 = arith.constant 0 : i32
    %c0_i32_0 = arith.constant 0 : i32
    %c0_i32_1 = arith.constant 0 : i32
    return %c0_i32, %c0_i32_0 : i32, i32
  }
  func.func @transform_2(%arg0: i32) -> (i32, i32) {
    %c0_i32 = arith.constant 0 : i32
    %c0_i32_0 = arith.constant 0 : i32
    %c0_i32_1 = arith.constant 0 : i32
    return %c0_i32, %c0_i32_0 : i32, i32
  }
  func.func @transform_3(%arg0: i32) -> (i32, i32) {
    %c0_i32 = arith.constant 0 : i32
    %c0_i32_0 = arith.constant 0 : i32
    %c0_i32_1 = arith.constant 0 : i32
    return %c0_i32, %c0_i32_0 : i32, i32
  }
  func.func @transform_4(%arg0: i32) -> (i32, i32) {
    %c0_i32 = arith.constant 0 : i32
    %c0_i32_0 = arith.constant 0 : i32
    %c0_i32_1 = arith.constant 0 : i32
    return %c0_i32, %c0_i32_0 : i32, i32
  }
  func.func @transform_5(%arg0: i32) -> (i32, i32) {
    %c0_i32 = arith.constant 0 : i32
    %c0_i32_0 = arith.constant 0 : i32
    return %arg0, %c0_i32 : i32, i32
  }
}

</mosaic_0001>

<bundles_post_ra>
// kernel: tpu_custom_call.1
= control target key start
LH: loop header
LB: loop body
LE: loop exit
PB: predicated region body
PF: predicated region fallthrough
CT: control target
= control target key end

     0   :  { %10 = vsyncpa [#allocation3], 0  ;;  %s956_s0 = inlined_call_operand.hbm [shape: f32[16,128], index: 0, kind: input, shape index: {}]   ;;  %s957_s1 = inlined_call_operand.hbm [shape: bf16[128,128], index: 1, kind: input, shape index: {}]   ;;  %s958_s2 = inlined_call_operand.vmem [shape: f32[1,128], index: 2, kind: input, shape index: {}]   ;;  %s959_s3 = inlined_call_operand.vmem [shape: f32[1,128], index: 3, kind: input, shape index: {}]   ;;  %s960_s4 = inlined_call_operand.vmem [shape: f32[1,128], index: 4, kind: input, shape index: {}]   ;;  %s961_s5 = inlined_call_operand.hbm [shape: f32[16,128], index: 5, kind: output, shape index: {}]  }
   0x1   :  { %12 = vsyncpa [#allocation3 + $0x1], 0 }
   0x2   :  { %13 = vsyncpa [#allocation6], 0 }
   0x3   :  { %14 = vsyncpa [#allocation4], 0 }
   0x4   :  { %16 = vsyncpa [#allocation4 + $0x1], 0  ;;  %s789_s18 = smov 0   ;;  %s791_s19 = smov 0  }
   0x5   :  { %s793_s20 = smov 0   ;;  %s795_s21 = smov 0  }
   0x6 LB: > { %s810_s22 = sadd.s32 4294967295, %s750_s21   ;;  %s501_s23 = sadd.s32 4294967294, %s750_s21   ;;  %s750_s21 = sphi %s795_s21, %s983_s21   ;;  %s746_s20 = sphi %s793_s20, %s982_s20   ;;  %s742_s19 = sphi %s791_s19, %s981_s19   ;;  %s738_s18 = sphi %s789_s18, %s980_s18  }
   0x7   : > { %p42_p0 = scmp.ne.s32.totalorder %s742_s19, %s738_s18  ;;  %p962_p1 = scmp.eq.s32.totalorder %s810_s22, 0 }
   0x8   : > { %p156_p3 = scmp.eq.s32.totalorder %s501_s23, 1  ;;  %p502_p5 = scmp.ge.s32.totalorder %s750_s21, 1 }
   0x9   : > { %p819_p4 = por %p962_p1, %p42_p0  ;;  %p163_p7 = scmp.lt.s32.totalorder %s750_s21, 3 }
   0xa   : > { %p824_p6 = por %p156_p3, %p42_p0  ;;  %s752_s27 = smov [#allocation5]  }
   0xb   : > { %s966_s24 = scalar_select %p819_p4, 1, 0 }
   0xc   : > { %s967_s25 = scalar_select %p824_p6, 1, 0 }
   0xd   : > { %p829_p8 = pnand %p502_p5, %p163_p7  ;;  %s175_s28 = sshll.u32 %s752_s27, 4  ;;  %s176_s28 = int_to_ptr.vmem [resolvable:$true] %s175_s28 }
   0xe   : > { %s843_s30 = sadd.s32 1, %s750_s21   ;;  %s29_s6 = sadd.s32 1, %s746_s20 }
   0xf   : > { %s968_s26 = scalar_select %p829_p8, 1, 0 }
  0x10   : > { %p563_p9 = pneg %p829_p8  ;;  %s26_s7 = ssub.s32 %s750_s21, %s843_s30 }
  0x11   : > { %s639_s8 = scalar_lea.vmem %s176_s28, 1024  ;;  %p647_p5 = scmp.lt.s32.totalorder %s176_s28, %s176_s28 }
  0x12   : > { %p838_p11 = pnand %p563_p9, %p962_p1  ;;  %p640_p13 = scmp.ne.s32.totalorder %s176_s28, %s639_s8 }
  0x13   : > { %p648_p7 = scmp.lt.s32.totalorder %s639_s8, %s639_s8 }
  0x14   : > { %p630_p12 = pneg %p838_p11 }
  0x15   : > { %p649_p10 = por %p648_p7, %p647_p5 }
  0x16   : > { %p642_p0 = pnand %p640_p13, %p630_p12 }
  0x18   : > { %p643_p3 = pneg %p642_p0 }
  0x1a   : > { %p650_p2 = pnand %p649_p10, %p643_p3 }
  0x1c   : > { %653 = shalt.err (!%p650_p2)
}
  0x1d   : > { %s753_s9 = smov 64   ;;  %s754_s10 = smov 4  }
  0x1e   : > { %566 = dma.hbm_to_vmem [thread:$0]  (!%p838_p11), %s957_s1, 1024, %s176_s28, [#allocation6], %s753_s9, %s753_s9, %s754_s10  }
  0x1f   : > { %p27_p9 = scmp.eq.s32.totalorder %s26_s7, 0  ;;  %p36_p12 = scmp.ne.s32.totalorder %s746_s20, %s742_s19 }
  0x20   : > { %p37_p10 = scmp.eq.s32.totalorder %s750_s21, 0  ;;  %p576_p2 = scmp.lt.s32.totalorder %s750_s21, 2 }
  0x21   : > { %s860_s13 = scalar_select %p27_p9, %s746_s20, %s29_s6  }
  0x22   : > { %p38_p13 = por %p37_p10, %p36_p12  ;;  %p970_p0 = scmp.eq.s32.totalorder %s810_s22, 1 }
  0x23   : > { %s198_s15 = sand.u32 1, %s746_s20   ;;  %s506_s16 = sshll.u32 %s750_s21, 7 }
  0x24   : > { %p864_p3 = por %p970_p0, %p36_p12  ;;  %s505_s17 = sshll.u32 %s198_s15, 3 }
  0x25   : > { %s873_s29 = scalar_lea.hbm %s956_s0, %s506_s16  ;;  %s202_s28 = scalar_lea.vmem [#allocation2], %s505_s17 }
  0x26   : > { %s971_s14 = scalar_select %p864_p3, 1, 0 }
  0x27   : > { %s209_s6 = sshll.u32 %s202_s28, 4  ;;  %p875_p11 = pnand %p576_p2, %p38_p13  ;;  %s210_s6 = int_to_ptr.vmem [resolvable:$true] %s209_s6 }
  0x28   : > { %s199_s8 = scalar_lea.sflag [#allocation3], %s198_s15  ;;  %s654_s9 = scalar_lea.hbm %s873_s29, 128 }
  0x29   : > { %p655_p5 = scmp.ne.s32.totalorder %s873_s29, %s654_s9  ;;  %p656_p7 = pneg %p875_p11 }
  0x2a   : > { %s659_s12 = scalar_lea.hbm %s956_s0, 256  ;;  %p660_p10 = scmp.lt.s32.totalorder %s873_s29, %s956_s0 }
  0x2b   : > { %p657_p9 = pnand %p656_p7, %p655_p5  ;;  %p661_p2 = scmp.lt.s32.totalorder %s659_s12, %s654_s9 }
  0x2d   : > { %p658_p12 = pneg %p657_p9  ;;  %p662_p13 = por %p661_p2, %p660_p10 }
  0x2f   : > { %p663_p0 = pnand %p662_p13, %p658_p12 }
  0x31   : > { %666 = shalt.err (!%p663_p0)
}
  0x32   : > { %s667_s23 = scalar_lea.vmem %s210_s6, 128  ;;  %s755_s15 = smov [#allocation2]  }
  0x33   : > { %p668_p1 = scmp.ne.s32.totalorder %s210_s6, %s667_s23  ;;  %s672_s27 = sshll.u32 %s755_s15, 4  ;;  %s673_s27 = int_to_ptr.vmem [resolvable:$false] %s672_s27 }
  0x34   : > { %s674_s28 = scalar_lea.vmem %s673_s27, 256  ;;  %p675_p5 = scmp.lt.s32.totalorder %s210_s6, %s673_s27 }
  0x35   : > { %p670_p6 = pnand %p668_p1, %p656_p7  ;;  %p676_p9 = scmp.lt.s32.totalorder %s674_s28, %s667_s23 }
  0x37   : > { %p671_p3 = pneg %p670_p6  ;;  %p677_p4 = por %p676_p9, %p675_p5 }
  0x39   : > { %p678_p8 = pnand %p677_p4, %p671_p3 }
  0x3b   : > { %681 = shalt.err (!%p678_p8)
}
  0x3c   : > { %570 = dma.hbm_to_vmem [thread:$0]  (!%p875_p11), %s873_s29, 128, %s210_s6, %s199_s8  }
  0x3d   : > { %p973_p12 = scmp.ne.s32.totalorder %s968_s26, 0 }
  0x3e   : > { %s896_s9 = sand.u32 (!%p973_p12), 1, %s742_s19   ;;  %p974_p1 = scmp.ne.s32.totalorder (!%p973_p12), %s966_s24, 0 }
  0x3f   : > { %218 = sbr.rel (%p973_p12) target bundleno = 639 (0x27f), region = 40  ;;  %s508_s10 = sshll.u32 (!%p973_p12), %s896_s9, 3 }
  0x40   : > { %s221_s11 = scalar_lea.sflag (!%p973_p12), [#allocation3], %s896_s9  ;;  %s224_s12 = scalar_lea.vmem (!%p973_p12), [#allocation2], %s508_s10 }
  0x44   : > { %725 = dma.done.wait (%p974_p1), %s221_s11, 128  }
  0x45   : > { %727 = vsyncadd (%p974_p1), %s221_s11, 4294967168  ;;  %p975_p4 = scmp.eq.s32.totalorder %s810_s22, 0 }
  0x47   : > { %729 = dma.done.wait (%p975_p4), [#allocation6], 1024   ;;  %p976_p6 = pmov %p975_p4 }
  0x48   : > { %v756_v0 = vmov 0.0   ;;  %vm757_vm0 = vmmov 0   ;;  %v616_v1 = vld [vmem:[#allocation5 + $0x38] sm:$0xff]   ;;  %v617_v2 = vld [vmem:[#allocation5 + $0x30] sm:$0xff]   ;;  %v618_v3 = vld [vmem:[#allocation5 + $0x28] sm:$0xff]   ;;  %s523_s16 = sshll.u32 %s810_s22, 7 }
  0x49   : > { %731 = vsyncadd (%p976_p6), [#allocation6], 4294966272  ;;  %535 = vmatprep.subr.bf16.mxu0 %v756_v0  ;;  %551 = vmatprep.mubr.msk.bf16.mxu0 %vm757_vm0, %v756_v0  ;;  %v619_v4 = vld [vmem:[#allocation5 + $0x20] sm:$0xff]   ;;  %v620_v5 = vld [vmem:[#allocation5 + $0x18] sm:$0xff]   ;;  %s254_s17 = scalar_lea.vmem [#allocation7], %s508_s10  ;;  %s419_s28 = scalar_lea.hbm %s961_s5, %s523_s16 }
  0x4a   : > { %536 = vmatpush3.bf16.msra.mxu0 %v616_v1  ;;  %v621_v6 = vld [vmem:[#allocation5 + $0x10] sm:$0xff]   ;;  %v622_v7 = vld [vmem:[#allocation5 + $0x8] sm:$0xff]   ;;  %v623_v8 = vld [vmem:[#allocation5] sm:$0xff]   ;;  %s421_s23 = sshll.u32 %s254_s17, 4  ;;  %s408_s11 = scalar_lea.sflag [#allocation4], %s896_s9  ;;  %s422_s23 = int_to_ptr.vmem [resolvable:$true] %s421_s23 }
  0x4b   : > { %537 = vmatprep.subr.bf16.mxu0 %v756_v0  ;;  %v256_v9 = vld [vmem:[%s224_s12] sm:$0xff]  ;;  %s682_s12 = scalar_lea.vmem %s422_s23, 128  ;;  %p977_p3 = scmp.ne.s32.totalorder %s971_s14, 0 }
  0x4c   : > { %v257_v10 = vpack.c.bf16 %v256_v9, %v256_v9  ;;  %v519_v12 = vld [vmem:[%s958_s2] ss:$0 sm:$0xff]  ;;  %p683_p8 = scmp.ne.s32.totalorder %s422_s23, %s682_s12  ;;  %s758_s24 = smov [#allocation7]  }
  0x4d   : > { %v520_v31 = vld [vmem:[%s959_s3] ss:$0 sm:$0xff]  ;;  %s686_s26 = sshll.u32 %s758_s24, 4  ;;  %s687_s26 = int_to_ptr.vmem [resolvable:$false] %s686_s26 }
  0x4e   : > { %538 = vmatpush3.bf16.msra.mxu0 %v617_v2  ;;  %v521_v33 = vld [vmem:[%s960_s4] ss:$0 sm:$0xff]  ;;  %p684_p11 = pnand %p683_p8, %p977_p3  ;;  %s688_s22 = scalar_lea.vmem %s687_s26, 256 }
  0x4f   : > { %539 = vmatprep.subr.bf16.mxu0 %v756_v0  ;;  %p689_p10 = scmp.lt.s32.totalorder %s422_s23, %s687_s26  ;;  %p690_p2 = scmp.lt.s32.totalorder %s688_s22, %s682_s12 }
  0x50   : > { %p685_p7 = pneg %p684_p11 }
  0x51   : > { %p691_p13 = por %p690_p2, %p689_p10 }
  0x52   : > { %540 = vmatpush3.bf16.msra.mxu0 %v618_v3 }
  0x53   : > { %541 = vmatprep.subr.bf16.mxu0 %v756_v0  ;;  %p692_p0 = pnand %p691_p13, %p685_p7 }
  0x56   : > { %542 = vmatpush3.bf16.msra.mxu0 %v619_v4 }
  0x57   : > { %543 = vmatprep.subr.bf16.mxu0 %v756_v0 }
  0x5a   : > { %544 = vmatpush3.bf16.msra.mxu0 %v620_v5 }
  0x5b   : > { %545 = vmatprep.subr.bf16.mxu0 %v756_v0 }
  0x5e   : > { %546 = vmatpush3.bf16.msra.mxu0 %v621_v6 }
  0x5f   : > { %547 = vmatprep.subr.bf16.mxu0 %v756_v0 }
  0x62   : > { %548 = vmatpush3.bf16.msra.mxu0 %v622_v7 }
  0x63   : > { %549 = vmatprep.subr.bf16.mxu0 %v756_v0 }
  0x66   : > { %550 = vmatpush3.bf16.msra.mxu0 %v623_v8 }
  0x69   : > { %552 = vmatmul.mubr.bf16.vlgmr.msra.gmra.mxu0 %v257_v10 }
 0x129   : > { %v356_v11 = vpop.f32.mrf.mxu0 }
 0x12a   : > { %v362_v13 = vadd.f32 %v356_v11, %v256_v9 }
 0x12b   : > { %v553_v14 = vpop.f32.mrf.mxu0 }
 0x12c   : > { %v370_v15 = vadd.f32 %v519_v12, %v362_v13 }
 0x12d   : > { %v359_v16 = vpop.f32.mrf.mxu0 }
 0x12e   : > { %371 = vadd.xlane.f32.xlu0 %v370_v15 }
 0x12f   : > { %v554_v17 = vpop.f32.mrf.mxu0 }
 0x1b7   : > { %v372_v18 = vpop.xlane.xlu0 %371 }
 0x1b8   : > { %v374_v19 = vmul.f32 0.0078125, %v372_v18 }
 0x1ba   : > { %v375_v20 = vsub.f32 %v370_v15, %v374_v19 }
 0x1bc   : > { %v376_v21 = vmul.f32 %v375_v20, %v375_v20 }
 0x1be   : > { %377 = vadd.xlane.f32.xlu0 %v376_v21 }
 0x247   : > { %v378_v22 = vpop.xlane.xlu0 %377 }
 0x248   : > { %v379_v23 = vmul.f32 0.007874016, %v378_v22 }
 0x24a   : > { %624 = vrsqrt.f32 %v379_v23  ;;  %vm382_vm1 = vcmp.eq.f32.partialorder %v379_v23, inf  ;;  %v385_v26 = vand.u32 2147483648, %v379_v23  ;;  %vm384_vm2 = vcmp.eq.f32.partialorder %v379_v23, 0.0 }
 0x257   : > { %v625_v24 = vpop.eup %624 }
 0x258   : > { %v381_v25 = vmul.f32 %v625_v24, %v379_v23 }
 0x25a   : > { %v383_v27 = vsel %vm382_vm1, %v379_v23, %v381_v25 }
 0x25b   : > { %v386_v28 = vsel %vm384_vm2, %v385_v26, %v383_v27 }
 0x25c   : > { %v387_v29 = vadd.f32 1e-06, %v386_v28 }
 0x25e   : > { %626 = vrcp.f32 %v387_v29 }
 0x26b   : > { %v627_v30 = vpop.eup %626 }
 0x26c   : > { %v390_v32 = vmul.f32 %v627_v30, %v375_v20 }
 0x26e   : > { %v397_v34 = vmul.f32 %v520_v31, %v390_v32 }
 0x270   : > { %v405_v35 = vadd.f32 %v521_v33, %v397_v34 }
 0x272   : > { %406 = vst [vmem:[%s254_s17] sm:$0xff] %v405_v35 }
 0x273   : > { %695 = shalt.err (!%p692_p0)
}
 0x274   : > { %s696_s10 = scalar_lea.hbm %s419_s28, 128  ;;  %s700_s6 = scalar_lea.hbm %s961_s5, 256 }
 0x275   : > { %p697_p5 = scmp.ne.s32.totalorder %s419_s28, %s696_s10  ;;  %p701_p1 = scmp.lt.s32.totalorder %s419_s28, %s961_s5 }
 0x276   : > { %p702_p4 = scmp.lt.s32.totalorder %s700_s6, %s696_s10 }
 0x277   : > { %p698_p9 = pnand %p697_p5, %p977_p3 }
 0x278   : > { %p703_p6 = por %p702_p4, %p701_p1 }
 0x279   : > { %p699_p12 = pneg %p698_p9 }
 0x27b   : > { %p704_p8 = pnand %p703_p6, %p699_p12 }
 0x27d   : > { %707 = shalt.err (!%p704_p8)
}
 0x27e   : > { %561 = dma.vmem_to_hbm [thread:$0]  (%p977_p3), %s422_s23, 128, %s419_s28, %s408_s11  }
 0x27f PF: > { %s433_s16 = sand.u32 1, %s738_s18   ;;  %p978_p11 = scmp.ne.s32.totalorder %s967_s25, 0 }
 0x280   : > { %p979_p7 = scmp.ge.s32.totalorder %s750_s21, 2  ;;  %s434_s17 = scalar_lea.sflag [#allocation4], %s433_s16 }
 0x282   : > { %p572_p10 = pnand %p979_p7, %p978_p11 }
 0x284   : > { %p573_p2 = pneg %p572_p10 }
 0x286   : > { %733 = dma.done.wait (%p573_p2), %s434_s17, 128  }
 0x287   : > { %735 = vsyncadd (%p573_p2), %s434_s17, 4294967168  ;;  %p19_p13 = scmp.ge.s32.totalorder %s843_s30, 4   ;;  %s980_s18 = smov %s742_s19 }
 0x288   : > { %s981_s19 = smov %s746_s20  ;;  %s982_s20 = smov %s860_s13 }
 0x289   : > { %s983_s21 = smov %s843_s30  ;;  %21 = sbr.rel (!%p19_p13) target bundleno = 6 (0x6), region = 89 }
 0x28e   :  { %439 = vsyncpa [#allocation3], 1 }
 0x28f   :  { %441 = vsyncpa [#allocation3 + $0x1], 1 }
 0x290   :  { %442 = vsyncpa [#allocation6], 1 }
 0x291   :  { %443 = vsyncpa [#allocation4], 1 }
 0x292   :  { %445 = vsyncpa [#allocation4 + $0x1], 1 }

// kernel: tpu_custom_call.1
= control target key start
LH: loop header
LB: loop body
LE: loop exit
PB: predicated region body
PF: predicated region fallthrough
CT: control target
= control target key end

     0   :  { %10 = vsyncpa [#allocation3], 0  ;;  %s956_s0 = inlined_call_operand.hbm [shape: f32[16,128], index: 0, kind: input, shape index: {}]   ;;  %s957_s1 = inlined_call_operand.hbm [shape: bf16[128,128], index: 1, kind: input, shape index: {}]   ;;  %s958_s2 = inlined_call_operand.vmem [shape: f32[1,128], index: 2, kind: input, shape index: {}]   ;;  %s959_s3 = inlined_call_operand.vmem [shape: f32[1,128], index: 3, kind: input, shape index: {}]   ;;  %s960_s4 = inlined_call_operand.vmem [shape: f32[1,128], index: 4, kind: input, shape index: {}]   ;;  %s961_s5 = inlined_call_operand.hbm [shape: f32[16,128], index: 5, kind: output, shape index: {}]  }
   0x1   :  { %12 = vsyncpa [#allocation3 + $0x1], 0 }
   0x2   :  { %13 = vsyncpa [#allocation6], 0 }
   0x3   :  { %14 = vsyncpa [#allocation4], 0 }
   0x4   :  { %16 = vsyncpa [#allocation4 + $0x1], 0  ;;  %s789_s18 = smov 0   ;;  %s791_s19 = smov 0  }
   0x5   :  { %s793_s20 = smov 0   ;;  %s795_s21 = smov 0  }
   0x6 LB: > { %s810_s22 = sadd.s32 4294967295, %s750_s21   ;;  %s501_s23 = sadd.s32 4294967294, %s750_s21   ;;  %s750_s21 = sphi %s795_s21, %s983_s21   ;;  %s746_s20 = sphi %s793_s20, %s982_s20   ;;  %s742_s19 = sphi %s791_s19, %s981_s19   ;;  %s738_s18 = sphi %s789_s18, %s980_s18  }
   0x7   : > { %p42_p0 = scmp.ne.s32.totalorder %s742_s19, %s738_s18  ;;  %p962_p1 = scmp.eq.s32.totalorder %s810_s22, 0 }
   0x8   : > { %p156_p3 = scmp.eq.s32.totalorder %s501_s23, 1  ;;  %p502_p5 = scmp.ge.s32.totalorder %s750_s21, 1 }
   0x9   : > { %p819_p4 = por %p962_p1, %p42_p0  ;;  %p163_p7 = scmp.lt.s32.totalorder %s750_s21, 3 }
   0xa   : > { %p824_p6 = por %p156_p3, %p42_p0  ;;  %s752_s27 = smov [#allocation5]  }
   0xb   : > { %s966_s24 = scalar_select %p819_p4, 1, 0 }
   0xc   : > { %s967_s25 = scalar_select %p824_p6, 1, 0 }
   0xd   : > { %p829_p8 = pnand %p502_p5, %p163_p7  ;;  %s175_s28 = sshll.u32 %s752_s27, 4  ;;  %s176_s28 = int_to_ptr.vmem [resolvable:$true] %s175_s28 }
   0xe   : > { %s843_s30 = sadd.s32 1, %s750_s21   ;;  %s29_s6 = sadd.s32 1, %s746_s20 }
   0xf   : > { %s968_s26 = scalar_select %p829_p8, 1, 0 }
  0x10   : > { %p563_p9 = pneg %p829_p8  ;;  %s26_s7 = ssub.s32 %s750_s21, %s843_s30 }
  0x11   : > { %s639_s8 = scalar_lea.vmem %s176_s28, 1024  ;;  %p647_p5 = scmp.lt.s32.totalorder %s176_s28, %s176_s28 }
  0x12   : > { %p838_p11 = pnand %p563_p9, %p962_p1  ;;  %p640_p13 = scmp.ne.s32.totalorder %s176_s28, %s639_s8 }
  0x13   : > { %p648_p7 = scmp.lt.s32.totalorder %s639_s8, %s639_s8 }
  0x14   : > { %p630_p12 = pneg %p838_p11 }
  0x15   : > { %p649_p10 = por %p648_p7, %p647_p5 }
  0x16   : > { %p642_p0 = pnand %p640_p13, %p630_p12 }
  0x18   : > { %p643_p3 = pneg %p642_p0 }
  0x1a   : > { %p650_p2 = pnand %p649_p10, %p643_p3 }
  0x1c   : > { %653 = shalt.err (!%p650_p2)
}
  0x1d   : > { %s753_s9 = smov 64   ;;  %s754_s10 = smov 4  }
  0x1e   : > { %566 = dma.hbm_to_vmem [thread:$0]  (!%p838_p11), %s957_s1, 1024, %s176_s28, [#allocation6], %s753_s9, %s753_s9, %s754_s10  }
  0x1f   : > { %p27_p9 = scmp.eq.s32.totalorder %s26_s7, 0  ;;  %p36_p12 = scmp.ne.s32.totalorder %s746_s20, %s742_s19 }
  0x20   : > { %p37_p10 = scmp.eq.s32.totalorder %s750_s21, 0  ;;  %p576_p2 = scmp.lt.s32.totalorder %s750_s21, 2 }
  0x21   : > { %s860_s13 = scalar_select %p27_p9, %s746_s20, %s29_s6  }
  0x22   : > { %p38_p13 = por %p37_p10, %p36_p12  ;;  %p970_p0 = scmp.eq.s32.totalorder %s810_s22, 1 }
  0x23   : > { %s198_s15 = sand.u32 1, %s746_s20   ;;  %s506_s16 = sshll.u32 %s750_s21, 7 }
  0x24   : > { %p864_p3 = por %p970_p0, %p36_p12  ;;  %s505_s17 = sshll.u32 %s198_s15, 3 }
  0x25   : > { %s873_s29 = scalar_lea.hbm %s956_s0, %s506_s16  ;;  %s202_s28 = scalar_lea.vmem [#allocation2], %s505_s17 }
  0x26   : > { %s971_s14 = scalar_select %p864_p3, 1, 0 }
  0x27   : > { %s209_s6 = sshll.u32 %s202_s28, 4  ;;  %p875_p11 = pnand %p576_p2, %p38_p13  ;;  %s210_s6 = int_to_ptr.vmem [resolvable:$true] %s209_s6 }
  0x28   : > { %s199_s8 = scalar_lea.sflag [#allocation3], %s198_s15  ;;  %s654_s9 = scalar_lea.hbm %s873_s29, 128 }
  0x29   : > { %p655_p5 = scmp.ne.s32.totalorder %s873_s29, %s654_s9  ;;  %p656_p7 = pneg %p875_p11 }
  0x2a   : > { %s659_s12 = scalar_lea.hbm %s956_s0, 256  ;;  %p660_p10 = scmp.lt.s32.totalorder %s873_s29, %s956_s0 }
  0x2b   : > { %p657_p9 = pnand %p656_p7, %p655_p5  ;;  %p661_p2 = scmp.lt.s32.totalorder %s659_s12, %s654_s9 }
  0x2d   : > { %p658_p12 = pneg %p657_p9  ;;  %p662_p13 = por %p661_p2, %p660_p10 }
  0x2f   : > { %p663_p0 = pnand %p662_p13, %p658_p12 }
  0x31   : > { %666 = shalt.err (!%p663_p0)
}
  0x32   : > { %s667_s23 = scalar_lea.vmem %s210_s6, 128  ;;  %s755_s15 = smov [#allocation2]  }
  0x33   : > { %p668_p1 = scmp.ne.s32.totalorder %s210_s6, %s667_s23  ;;  %s672_s27 = sshll.u32 %s755_s15, 4  ;;  %s673_s27 = int_to_ptr.vmem [resolvable:$false] %s672_s27 }
  0x34   : > { %s674_s28 = scalar_lea.vmem %s673_s27, 256  ;;  %p675_p5 = scmp.lt.s32.totalorder %s210_s6, %s673_s27 }
  0x35   : > { %p670_p6 = pnand %p668_p1, %p656_p7  ;;  %p676_p9 = scmp.lt.s32.totalorder %s674_s28, %s667_s23 }
  0x37   : > { %p671_p3 = pneg %p670_p6  ;;  %p677_p4 = por %p676_p9, %p675_p5 }
  0x39   : > { %p678_p8 = pnand %p677_p4, %p671_p3 }
  0x3b   : > { %681 = shalt.err (!%p678_p8)
}
  0x3c   : > { %570 = dma.hbm_to_vmem [thread:$0]  (!%p875_p11), %s873_s29, 128, %s210_s6, %s199_s8  }
  0x3d   : > { %p973_p12 = scmp.ne.s32.totalorder %s968_s26, 0 }
  0x3e   : > { %s896_s9 = sand.u32 (!%p973_p12), 1, %s742_s19   ;;  %p974_p1 = scmp.ne.s32.totalorder (!%p973_p12), %s966_s24, 0 }
  0x3f   : > { %218 = sbr.rel (%p973_p12) target bundleno = 639 (0x27f), region = 40  ;;  %s508_s10 = sshll.u32 (!%p973_p12), %s896_s9, 3 }
  0x40   : > { %s221_s11 = scalar_lea.sflag (!%p973_p12), [#allocation3], %s896_s9  ;;  %s224_s12 = scalar_lea.vmem (!%p973_p12), [#allocation2], %s508_s10 }
  0x44   : > { %725 = dma.done.wait (%p974_p1), %s221_s11, 128  }
  0x45   : > { %727 = vsyncadd (%p974_p1), %s221_s11, 4294967168  ;;  %p975_p4 = scmp.eq.s32.totalorder %s810_s22, 0 }
  0x47   : > { %729 = dma.done.wait (%p975_p4), [#allocation6], 1024   ;;  %p976_p6 = pmov %p975_p4 }
  0x48   : > { %v756_v0 = vmov 0.0   ;;  %vm757_vm0 = vmmov 0   ;;  %v616_v1 = vld [vmem:[#allocation5 + $0x38] sm:$0xff]   ;;  %v617_v2 = vld [vmem:[#allocation5 + $0x30] sm:$0xff]   ;;  %v618_v3 = vld [vmem:[#allocation5 + $0x28] sm:$0xff]   ;;  %s523_s16 = sshll.u32 %s810_s22, 7 }
  0x49   : > { %731 = vsyncadd (%p976_p6), [#allocation6], 4294966272  ;;  %535 = vmatprep.subr.bf16.mxu0 %v756_v0  ;;  %551 = vmatprep.mubr.msk.bf16.mxu0 %vm757_vm0, %v756_v0  ;;  %v619_v4 = vld [vmem:[#allocation5 + $0x20] sm:$0xff]   ;;  %v620_v5 = vld [vmem:[#allocation5 + $0x18] sm:$0xff]   ;;  %s254_s17 = scalar_lea.vmem [#allocation7], %s508_s10  ;;  %s419_s28 = scalar_lea.hbm %s961_s5, %s523_s16 }
  0x4a   : > { %536 = vmatpush3.bf16.msra.mxu0 %v616_v1  ;;  %v621_v6 = vld [vmem:[#allocation5 + $0x10] sm:$0xff]   ;;  %v622_v7 = vld [vmem:[#allocation5 + $0x8] sm:$0xff]   ;;  %v623_v8 = vld [vmem:[#allocation5] sm:$0xff]   ;;  %s421_s23 = sshll.u32 %s254_s17, 4  ;;  %s408_s11 = scalar_lea.sflag [#allocation4], %s896_s9  ;;  %s422_s23 = int_to_ptr.vmem [resolvable:$true] %s421_s23 }
  0x4b   : > { %537 = vmatprep.subr.bf16.mxu0 %v756_v0  ;;  %v256_v9 = vld [vmem:[%s224_s12] sm:$0xff]  ;;  %s682_s12 = scalar_lea.vmem %s422_s23, 128  ;;  %p977_p3 = scmp.ne.s32.totalorder %s971_s14, 0 }
  0x4c   : > { %v257_v10 = vpack.c.bf16 %v256_v9, %v256_v9  ;;  %v519_v12 = vld [vmem:[%s958_s2] ss:$0 sm:$0xff]  ;;  %p683_p8 = scmp.ne.s32.totalorder %s422_s23, %s682_s12  ;;  %s758_s24 = smov [#allocation7]  }
  0x4d   : > { %v520_v31 = vld [vmem:[%s959_s3] ss:$0 sm:$0xff]  ;;  %s686_s26 = sshll.u32 %s758_s24, 4  ;;  %s687_s26 = int_to_ptr.vmem [resolvable:$false] %s686_s26 }
  0x4e   : > { %538 = vmatpush3.bf16.msra.mxu0 %v617_v2  ;;  %v521_v33 = vld [vmem:[%s960_s4] ss:$0 sm:$0xff]  ;;  %p684_p11 = pnand %p683_p8, %p977_p3  ;;  %s688_s22 = scalar_lea.vmem %s687_s26, 256 }
  0x4f   : > { %539 = vmatprep.subr.bf16.mxu0 %v756_v0  ;;  %p689_p10 = scmp.lt.s32.totalorder %s422_s23, %s687_s26  ;;  %p690_p2 = scmp.lt.s32.totalorder %s688_s22, %s682_s12 }
  0x50   : > { %p685_p7 = pneg %p684_p11 }
  0x51   : > { %p691_p13 = por %p690_p2, %p689_p10 }
  0x52   : > { %540 = vmatpush3.bf16.msra.mxu0 %v618_v3 }
  0x53   : > { %541 = vmatprep.subr.bf16.mxu0 %v756_v0  ;;  %p692_p0 = pnand %p691_p13, %p685_p7 }
  0x56   : > { %542 = vmatpush3.bf16.msra.mxu0 %v619_v4 }
  0x57   : > { %543 = vmatprep.subr.bf16.mxu0 %v756_v0 }
  0x5a   : > { %544 = vmatpush3.bf16.msra.mxu0 %v620_v5 }
  0x5b   : > { %545 = vmatprep.subr.bf16.mxu0 %v756_v0 }
  0x5e   : > { %546 = vmatpush3.bf16.msra.mxu0 %v621_v6 }
  0x5f   : > { %547 = vmatprep.subr.bf16.mxu0 %v756_v0 }
  0x62   : > { %548 = vmatpush3.bf16.msra.mxu0 %v622_v7 }
  0x63   : > { %549 = vmatprep.subr.bf16.mxu0 %v756_v0 }
  0x66   : > { %550 = vmatpush3.bf16.msra.mxu0 %v623_v8 }
  0x69   : > { %552 = vmatmul.mubr.bf16.vlgmr.msra.gmra.mxu0 %v257_v10 }
 0x129   : > { %v356_v11 = vpop.f32.mrf.mxu0 }
 0x12a   : > { %v362_v13 = vadd.f32 %v356_v11, %v256_v9 }
 0x12b   : > { %v553_v14 = vpop.f32.mrf.mxu0 }
 0x12c   : > { %v370_v15 = vadd.f32 %v519_v12, %v362_v13 }
 0x12d   : > { %v359_v16 = vpop.f32.mrf.mxu0 }
 0x12e   : > { %371 = vadd.xlane.f32.xlu0 %v370_v15 }
 0x12f   : > { %v554_v17 = vpop.f32.mrf.mxu0 }
 0x1b7   : > { %v372_v18 = vpop.xlane.xlu0 %371 }
 0x1b8   : > { %v374_v19 = vmul.f32 0.0078125, %v372_v18 }
 0x1ba   : > { %v375_v20 = vsub.f32 %v370_v15, %v374_v19 }
 0x1bc   : > { %v376_v21 = vmul.f32 %v375_v20, %v375_v20 }
 0x1be   : > { %377 = vadd.xlane.f32.xlu0 %v376_v21 }
 0x247   : > { %v378_v22 = vpop.xlane.xlu0 %377 }
 0x248   : > { %v379_v23 = vmul.f32 0.007874016, %v378_v22 }
 0x24a   : > { %624 = vrsqrt.f32 %v379_v23  ;;  %vm382_vm1 = vcmp.eq.f32.partialorder %v379_v23, inf  ;;  %v385_v26 = vand.u32 2147483648, %v379_v23  ;;  %vm384_vm2 = vcmp.eq.f32.partialorder %v379_v23, 0.0 }
 0x257   : > { %v625_v24 = vpop.eup %624 }
 0x258   : > { %v381_v25 = vmul.f32 %v625_v24, %v379_v23 }
 0x25a   : > { %v383_v27 = vsel %vm382_vm1, %v379_v23, %v381_v25 }
 0x25b   : > { %v386_v28 = vsel %vm384_vm2, %v385_v26, %v383_v27 }
 0x25c   : > { %v387_v29 = vadd.f32 1e-06, %v386_v28 }
 0x25e   : > { %626 = vrcp.f32 %v387_v29 }
 0x26b   : > { %v627_v30 = vpop.eup %626 }
 0x26c   : > { %v390_v32 = vmul.f32 %v627_v30, %v375_v20 }
 0x26e   : > { %v397_v34 = vmul.f32 %v520_v31, %v390_v32 }
 0x270   : > { %v405_v35 = vadd.f32 %v521_v33, %v397_v34 }
 0x272   : > { %406 = vst [vmem:[%s254_s17] sm:$0xff] %v405_v35 }
 0x273   : > { %695 = shalt.err (!%p692_p0)
}
 0x274   : > { %s696_s10 = scalar_lea.hbm %s419_s28, 128  ;;  %s700_s6 = scalar_lea.hbm %s961_s5, 256 }
 0x275   : > { %p697_p5 = scmp.ne.s32.totalorder %s419_s28, %s696_s10  ;;  %p701_p1 = scmp.lt.s32.totalorder %s419_s28, %s961_s5 }
 0x276   : > { %p702_p4 = scmp.lt.s32.totalorder %s700_s6, %s696_s10 }
 0x277   : > { %p698_p9 = pnand %p697_p5, %p977_p3 }
 0x278   : > { %p703_p6 = por %p702_p4, %p701_p1 }
 0x279   : > { %p699_p12 = pneg %p698_p9 }
 0x27b   : > { %p704_p8 = pnand %p703_p6, %p699_p12 }
 0x27d   : > { %707 = shalt.err (!%p704_p8)
}
 0x27e   : > { %561 = dma.vmem_to_hbm [thread:$0]  (%p977_p3), %s422_s23, 128, %s419_s28, %s408_s11  }
 0x27f PF: > { %s433_s16 = sand.u32 1, %s738_s18   ;;  %p978_p11 = scmp.ne.s32.totalorder %s967_s25, 0 }
 0x280   : > { %p979_p7 = scmp.ge.s32.totalorder %s750_s21, 2  ;;  %s434_s17 = scalar_lea.sflag [#allocation4], %s433_s16 }
 0x282   : > { %p572_p10 = pnand %p979_p7, %p978_p11 }
 0x284   : > { %p573_p2 = pneg %p572_p10 }
 0x286   : > { %733 = dma.done.wait (%p573_p2), %s434_s17, 128  }
 0x287   : > { %735 = vsyncadd (%p573_p2), %s434_s17, 4294967168  ;;  %p19_p13 = scmp.ge.s32.totalorder %s843_s30, 4   ;;  %s980_s18 = smov %s742_s19 }
 0x288   : > { %s981_s19 = smov %s746_s20  ;;  %s982_s20 = smov %s860_s13 }
 0x289   : > { %s983_s21 = smov %s843_s30  ;;  %21 = sbr.rel (!%p19_p13) target bundleno = 6 (0x6), region = 89 }
 0x28e   :  { %439 = vsyncpa [#allocation3], 1 }
 0x28f   :  { %441 = vsyncpa [#allocation3 + $0x1], 1 }
 0x290   :  { %442 = vsyncpa [#allocation6], 1 }
 0x291   :  { %443 = vsyncpa [#allocation4], 1 }
 0x292   :  { %445 = vsyncpa [#allocation4 + $0x1], 1 }

</bundles_post_ra>
